<compile_context>
chip_gen: v7x
topology: tpu7x:2x2x1
jax: 0.10.0
libtpu: 0.0.40
codegen_flags: <defaults>
</compile_context>

<pallas_src>
import numpy as np
import jax
import jax.numpy as jnp
from jax.experimental import pallas as pl
from jax.experimental.pallas import tpu as pltpu  # noqa: F401  (not needed at this scale)

# ------------------------- config (deterministic, small-scale) -------------------------
GAIN = 0.8               # RandomVolume_wav (fixed)
NOISE_SCALE = 0.01       # RandomAbsoluteNoise_wav (fixed)
N_FFT = 32               # small-scale stand-in for n_fft=400 (n_freq = N_FFT//2 + 1)
HOP = 8                  # small-scale stand-in for hop_length=256
FREQ_MASK = (4, 3)       # (f0, width)  -- RandomFrequencyMasking_spec (fixed)
TIME_MASK = (10, 5)      # (t0, width)  -- RandomTimeMasking_spec (fixed)
TARGET_SHAPE = (16, 32)  # shape_of_untransformed_size[-2:]


# ------------------------- fused Pallas kernel -------------------------
def pipeline_kernel(wav_ref, gain_ref, noise_ref, b_ref, r_ref, o_ref):
    """Fused forward pass.

    wav_ref  : (C_in, T)        raw waveform (C_in = 1 or 2)
    gain_ref : (1, T)           GAIN * fade envelope
    noise_ref: (2, T)           NOISE_SCALE * fade * noise (per channel)
    b_ref    : (T, 2*HALF) bf16 reflect-pad + framing + Hann + DFT, columns
                                packed [re blocks | im blocks], HALF % 128 == 0
    r_ref    : (HALF, F_out*T_out) bf16 freq/time masks + bilinear resize
    o_ref    : (2, F_out*T_out) f32 (lane-dense)
    """
    half = b_ref.shape[1] // 2

    # to_stereo + RandomVolume + RandomAbsoluteNoise + RandomFade (pre-folded).
    # (1,T)*(1,T) + (2,T) broadcasts mono -> stereo; elementwise math kept f32.
    y = wav_ref[...] * gain_ref[...] + noise_ref[...]               # (2, T) f32

    # reflect-pad + framing + window + DFT as ONE MXU matmul (bf16 in, f32 acc).
    p = jnp.dot(y.astype(jnp.bfloat16), b_ref[...],
                preferred_element_type=jnp.float32)                 # (2, 2*HALF) f32

    # lane-aligned re/im split (HALF is a multiple of 128 -> free static views).
    re = p[:, :half]
    im = p[:, half:]
    mag = jnp.sqrt(re * re + im * im)                               # (2, HALF) f32

    # freq masking + time masking + bilinear resize folded into one matmul.
    out = jnp.dot(mag.astype(jnp.bfloat16), r_ref[...],
                  preferred_element_type=jnp.float32)               # (2, F_out*T_out)
    o_ref[...] = out.astype(o_ref.dtype)


# ------------------------- host-side constants / wrapper -------------------------
def _bilinear_matrix(out_size, in_size):
    """Row-stochastic bilinear resize matrix matching F.interpolate(...,
    mode='bilinear', align_corners=False, antialias=False)."""
    W = np.zeros((out_size, in_size), dtype=np.float32)
    scale = in_size / out_size
    for i in range(out_size):
        xx = max((i + 0.5) * scale - 0.5, 0.0)
        x0 = min(int(np.floor(xx)), in_size - 1)
        x1 = min(x0 + 1, in_size - 1)
        lam = xx - x0
        W[i, x0] += 1.0 - lam
        W[i, x1] += lam
    return W


def _build_constants(T):
    pad = N_FFT // 2
    n_freq = N_FFT // 2 + 1
    n_frames = (T + 2 * pad - N_FFT) // HOP + 1
    F_out, T_out = TARGET_SHAPE
    half = ((n_frames * n_freq + 127) // 128) * 128    # lane-align the re/im halves

    # --- fade envelope with GAIN / NOISE_SCALE folded in (deterministic stand-ins) ---
    fade = np.ones((T,), np.float32)
    fl = T // 4
    fade[:fl] = np.linspace(0.0, 1.0, fl, dtype=np.float32)
    fade[-fl:] = np.linspace(1.0, 0.0, fl, dtype=np.float32)
    gain_env = (GAIN * fade)[None, :]                               # (1, T)
    rng = np.random.default_rng(1)
    noise_term = (rng.standard_normal((2, T)).astype(np.float32)
                  * (NOISE_SCALE * fade)[None, :])                  # (2, T)

    # --- B: reflect-pad + framing + Hann window + DFT folded into one matrix ---
    m = np.arange(N_FFT)
    win = 0.5 * (1.0 - np.cos(2.0 * np.pi * m / N_FFT))             # periodic Hann
    k = np.arange(n_freq)
    ang = 2.0 * np.pi * np.outer(m, k) / N_FFT                      # (n_fft, n_freq)
    dcos = win[:, None] * np.cos(ang)
    dsin = -win[:, None] * np.sin(ang)

    def refl(p_idx):   # torch center=True 'reflect' padding source index
        if p_idx < pad:
            return pad - p_idx
        if p_idx >= pad + T:
            return 2 * T + pad - 2 - p_idx
        return p_idx - pad

    B = np.zeros((T, 2 * half), np.float32)
    for fr in range(n_frames):
        col = fr * n_freq
        for mm in range(N_FFT):
            s = refl(fr * HOP + mm)
            B[s, col:col + n_freq] += dcos[mm]
            B[s, half + col:half + col + n_freq] += dsin[mm]

    # --- R: freq/time masks (zeroed source rows) folded into the bilinear resize ---
    WF = _bilinear_matrix(F_out, n_freq)          # (F_out, n_freq)
    WT = _bilinear_matrix(T_out, n_frames)        # (T_out, n_frames)
    WF[:, FREQ_MASK[0]:FREQ_MASK[0] + FREQ_MASK[1]] = 0.0
    WT[:, TIME_MASK[0]:TIME_MASK[0] + TIME_MASK[1]] = 0.0
    # R[(n, f), (fo, to)] = WF[fo, f] * WT[to, n]   (flat mag layout: n*n_freq + f)
    R = np.zeros((half, F_out * T_out), np.float32)
    R[:n_frames * n_freq, :] = np.einsum('of,tn->nfot', WF, WT).reshape(
        n_frames * n_freq, F_out * T_out)

    return gain_env, noise_term, B, R


def my_pipeline(waveform):
    """waveform: (1, T) or (2, T) float32 -> (2, F_target, T_target) float32."""
    _, T = waveform.shape
    F_out, T_out = TARGET_SHAPE
    gain_env, noise_term, B, R = _build_constants(T)

    # Single fused launch; every operand fits easily in VMEM, so whole-array
    # blocks with no grid are the right tiling at this scale.
    out_flat = pl.pallas_call(
        pipeline_kernel,
        out_shape=jax.ShapeDtypeStruct((2, F_out * T_out), jnp.float32),
    )(waveform.astype(jnp.float32),
      jnp.asarray(gain_env),
      jnp.asarray(noise_term),
      jnp.asarray(B, dtype=jnp.bfloat16),
      jnp.asarray(R, dtype=jnp.bfloat16))

    return out_flat.reshape(2, F_out, T_out)


if __name__ == "__main__":
    key = jax.random.PRNGKey(0)
    wav = jax.random.normal(key, (1, 256), dtype=jnp.float32)   # mono input, T=256
    out = jax.block_until_ready(jax.jit(my_pipeline)(wav))
    assert out.shape == (2, TARGET_SHAPE[0], TARGET_SHAPE[1]), out.shape
    assert bool(jnp.all(jnp.isfinite(out)))
    print("KERNEL_OK")
</pallas_src>

<mosaic_0001>
module attributes {stable_mosaic.version = 11 : i64} {
  func.func @pipeline_kernel(%arg0: memref<1x256xf32, #tpu.memory_space<vmem>>, %arg1: memref<1x256xf32, #tpu.memory_space<vmem>>, %arg2: memref<2x256xf32, #tpu.memory_space<vmem>>, %arg3: memref<256x1280xbf16, #tpu.memory_space<vmem>>, %arg4: memref<640x512xbf16, #tpu.memory_space<vmem>>, %arg5: memref<2x512xf32, #tpu.memory_space<vmem>>) attributes {dimension_semantics = [], scalar_prefetch = 0 : i64, scratch_operands = 0 : i64, tpu.core_type = #tpu.core_type<tc>} {
    %c0 = arith.constant 0 : index
    %c0_0 = arith.constant 0 : index
    %0 = vector.load %arg0[%c0, %c0_0] : memref<1x256xf32, #tpu.memory_space<vmem>>, vector<1x256xf32>
    %c0_1 = arith.constant 0 : index
    %c0_2 = arith.constant 0 : index
    %1 = vector.load %arg1[%c0_1, %c0_2] : memref<1x256xf32, #tpu.memory_space<vmem>>, vector<1x256xf32>
    %2 = arith.mulf %0, %1 : vector<1x256xf32>
    %c0_3 = arith.constant 0 : index
    %c0_4 = arith.constant 0 : index
    %3 = vector.load %arg2[%c0_3, %c0_4] : memref<2x256xf32, #tpu.memory_space<vmem>>, vector<2x256xf32>
    %4 = vector.broadcast %2 : vector<1x256xf32> to vector<2x256xf32>
    %5 = arith.addf %4, %3 : vector<2x256xf32>
    %6 = arith.truncf %5 : vector<2x256xf32> to vector<2x256xbf16>
    %c0_5 = arith.constant 0 : index
    %c0_6 = arith.constant 0 : index
    %7 = vector.load %arg3[%c0_5, %c0_6] : memref<256x1280xbf16, #tpu.memory_space<vmem>>, vector<256x1280xbf16>
    %cst = arith.constant dense<0.000000e+00> : vector<2x1280xf32>
    %8 = tpu.matmul %6, %7, %cst {dimension_numbers = #tpu.dot_dimension_numbers<[1], [0], [0], [1], [0, 0, 1, 1], [], []>} : vector<2x256xbf16>, vector<256x1280xbf16>, vector<2x1280xf32> -> vector<2x1280xf32>
    %9 = vector.extract_strided_slice %8 {offsets = [0, 0], sizes = [2, 640], strides = [1, 1]} : vector<2x1280xf32> to vector<2x640xf32>
    %10 = vector.extract_strided_slice %8 {offsets = [0, 640], sizes = [2, 640], strides = [1, 1]} : vector<2x1280xf32> to vector<2x640xf32>
    %11 = arith.mulf %9, %9 : vector<2x640xf32>
    %12 = arith.mulf %10, %10 : vector<2x640xf32>
    %13 = arith.addf %11, %12 : vector<2x640xf32>
    %14 = math.sqrt %13 : vector<2x640xf32>
    %15 = arith.truncf %14 : vector<2x640xf32> to vector<2x640xbf16>
    %c0_7 = arith.constant 0 : index
    %c0_8 = arith.constant 0 : index
    %16 = vector.load %arg4[%c0_7, %c0_8] : memref<640x512xbf16, #tpu.memory_space<vmem>>, vector<640x512xbf16>
    %cst_9 = arith.constant dense<0.000000e+00> : vector<2x512xf32>
    %17 = tpu.matmul %15, %16, %cst_9 {dimension_numbers = #tpu.dot_dimension_numbers<[1], [0], [0], [1], [0, 0, 1, 1], [], []>} : vector<2x640xbf16>, vector<640x512xbf16>, vector<2x512xf32> -> vector<2x512xf32>
    %c0_10 = arith.constant 0 : index
    %c0_11 = arith.constant 0 : index
    %18 = vector.load %arg5[%c0_10, %c0_11] : memref<2x512xf32, #tpu.memory_space<vmem>>, vector<2x512xf32>
    tpu.vector_store %arg5[%c0_10, %c0_11], %17 {strides = array<i32>} : memref<2x512xf32, #tpu.memory_space<vmem>>, vector<2x512xf32>,
    return
  }
}

</mosaic_0001>

<bundles_post_ra>
// kernel: my_pipeline.1
= control target key start
LH: loop header
LB: loop body
LE: loop exit
PB: predicated region body
PF: predicated region fallthrough
CT: control target
= control target key end

     0   :  { %v26_v38 = vlaneseq  ;;  %s4378_s3 = inlined_call_operand.vmem [shape: bf16[256,1280], index: 3, kind: input, shape index: {}]   ;;  %s4379_s0 = inlined_call_operand.vmem [shape: f32[1,256], index: 0, kind: input, shape index: {}]   ;;  %s4380_s1 = inlined_call_operand.vmem [shape: f32[1,256], index: 1, kind: input, shape index: {}]   ;;  %s4381_s2 = inlined_call_operand.vmem [shape: f32[2,256], index: 2, kind: input, shape index: {}]   ;;  %s4382_s4 = inlined_call_operand.vmem [shape: bf16[640,512], index: 4, kind: input, shape index: {}]   ;;  %s4383_s5 = inlined_call_operand.vmem [shape: f32[2,512], index: 5, kind: output, shape index: {}]  }
   0x1   :  { %v2841_v0 = vld [vmem:[%s4378_s3 + $0x4] ss:$40 sps:$4 sm:$0xff]   ;;  %v2845_v2 = vld [vmem:[%s4378_s3] ss:$40 sps:$4 sm:$0xff]   ;;  %v2847_v4 = vld [vmem:[%s4378_s3 + $0x54] ss:$40 sps:$4 sm:$0xff]  }
   0x2   :  { %v2843_v1 = vld [vmem:[%s4378_s3 + $0xc] ss:$40 sps:$4 sm:$0xff]   ;;  %1011 = vmatprep.subr.bf16.mxu0 %v2841_v0  ;;  %v2846_v3 = vld [vmem:[%s4378_s3 + $0x8] ss:$40 sps:$4 sm:$0xff]   ;;  %v2849_v5 = vld [vmem:[%s4378_s3 + $0x5c] ss:$40 sps:$4 sm:$0xff]  }
   0x3   :  { %1052 = vmatprep.subr.bf16.mxu1 %v2843_v1  ;;  %1012 = vmatpush1.bf16.msra.mxu0 %v2845_v2  ;;  %v2851_v6 = vld [vmem:[%s4378_s3 + $0x50] ss:$40 sps:$4 sm:$0xff]   ;;  %v2853_v8 = vld [vmem:[%s4378_s3 + $0xa4] ss:$40 sps:$4 sm:$0xff]   ;;  %v2857_v10 = vld [vmem:[%s4378_s3 + $0xa0] ss:$40 sps:$4 sm:$0xff]  }
   0x4   :  { %1053 = vmatpush1.bf16.msra.mxu1 %v2846_v3  ;;  %1013 = vmatprep.subr.bf16.mxu0 %v2847_v4  ;;  %v2852_v7 = vld [vmem:[%s4378_s3 + $0x58] ss:$40 sps:$4 sm:$0xff]   ;;  %v2855_v9 = vld [vmem:[%s4378_s3 + $0xac] ss:$40 sps:$4 sm:$0xff]   ;;  %v2858_v11 = vld [vmem:[%s4378_s3 + $0xa8] ss:$40 sps:$4 sm:$0xff]  }
   0x5   :  { %1054 = vmatprep.subr.bf16.mxu1 %v2849_v5  ;;  %v2859_v12 = vld [vmem:[%s4378_s3 + $0xf4] ss:$40 sps:$4 sm:$0xff]   ;;  %v2863_v14 = vld [vmem:[%s4378_s3 + $0xf0] ss:$40 sps:$4 sm:$0xff]   ;;  %v2865_v16 = vld [vmem:[%s4378_s3 + $0x144] ss:$40 sps:$4 sm:$0xff]  }
   0x6   :  { %v2861_v13 = vld [vmem:[%s4378_s3 + $0xfc] ss:$40 sps:$4 sm:$0xff]   ;;  %v2864_v15 = vld [vmem:[%s4378_s3 + $0xf8] ss:$40 sps:$4 sm:$0xff]   ;;  %v2867_v17 = vld [vmem:[%s4378_s3 + $0x14c] ss:$40 sps:$4 sm:$0xff]  }
   0x7   :  { %1014 = vmatpush1.bf16.msra.mxu0 %v2851_v6  ;;  %v2869_v18 = vld [vmem:[%s4378_s3 + $0x140] ss:$40 sps:$4 sm:$0xff]   ;;  %v2871_v20 = vld [vmem:[%s4378_s3 + $0x194] ss:$40 sps:$4 sm:$0xff]   ;;  %v2875_v22 = vld [vmem:[%s4378_s3 + $0x190] ss:$40 sps:$4 sm:$0xff]  }
   0x8   :  { %1055 = vmatpush1.bf16.msra.mxu1 %v2852_v7  ;;  %1015 = vmatprep.subr.bf16.mxu0 %v2853_v8  ;;  %v2870_v19 = vld [vmem:[%s4378_s3 + $0x148] ss:$40 sps:$4 sm:$0xff]   ;;  %v2873_v21 = vld [vmem:[%s4378_s3 + $0x19c] ss:$40 sps:$4 sm:$0xff]   ;;  %v2876_v23 = vld [vmem:[%s4378_s3 + $0x198] ss:$40 sps:$4 sm:$0xff]  }
   0x9   :  { %1056 = vmatprep.subr.bf16.mxu1 %v2855_v9  ;;  %v2877_v24 = vld [vmem:[%s4378_s3 + $0x1e4] ss:$40 sps:$4 sm:$0xff]   ;;  %v2881_v26 = vld [vmem:[%s4378_s3 + $0x1e0] ss:$40 sps:$4 sm:$0xff]   ;;  %v2883_v28 = vld [vmem:[%s4378_s3 + $0x234] ss:$40 sps:$4 sm:$0xff]  }
   0xa   :  { %v2879_v25 = vld [vmem:[%s4378_s3 + $0x1ec] ss:$40 sps:$4 sm:$0xff]   ;;  %v2882_v27 = vld [vmem:[%s4378_s3 + $0x1e8] ss:$40 sps:$4 sm:$0xff]   ;;  %v2885_v29 = vld [vmem:[%s4378_s3 + $0x23c] ss:$40 sps:$4 sm:$0xff]  }
   0xb   :  { %1016 = vmatpush1.bf16.msra.mxu0 %v2857_v10  ;;  %v2887_v30 = vld [vmem:[%s4378_s3 + $0x230] ss:$40 sps:$4 sm:$0xff]   ;;  %v2889_v32 = vld [vmem:[%s4378_s3 + $0x284] ss:$40 sps:$4 sm:$0xff]   ;;  %v2893_v34 = vld [vmem:[%s4378_s3 + $0x280] ss:$40 sps:$4 sm:$0xff]  }
   0xc   :  { %1057 = vmatpush1.bf16.msra.mxu1 %v2858_v11  ;;  %1017 = vmatprep.subr.bf16.mxu0 %v2859_v12  ;;  %v2888_v31 = vld [vmem:[%s4378_s3 + $0x238] ss:$40 sps:$4 sm:$0xff]   ;;  %v2891_v33 = vld [vmem:[%s4378_s3 + $0x28c] ss:$40 sps:$4 sm:$0xff]   ;;  %v2894_v35 = vld [vmem:[%s4378_s3 + $0x288] ss:$40 sps:$4 sm:$0xff]  }
   0xd   :  { %1058 = vmatprep.subr.bf16.mxu1 %v2861_v13  ;;  %v2895_v36 = vld [vmem:[%s4378_s3 + $0x2d4] ss:$40 sps:$4 sm:$0xff]   ;;  %v2899_v39 = vld [vmem:[%s4378_s3 + $0x2d0] ss:$40 sps:$4 sm:$0xff]   ;;  %v2901_v41 = vld [vmem:[%s4378_s3 + $0x324] ss:$40 sps:$4 sm:$0xff]  }
   0xe   :  { %v2897_v37 = vld [vmem:[%s4378_s3 + $0x2dc] ss:$40 sps:$4 sm:$0xff]   ;;  %v2900_v40 = vld [vmem:[%s4378_s3 + $0x2d8] ss:$40 sps:$4 sm:$0xff]   ;;  %v2903_v42 = vld [vmem:[%s4378_s3 + $0x32c] ss:$40 sps:$4 sm:$0xff]  }
   0xf   :  { %1018 = vmatpush1.bf16.msra.mxu0 %v2863_v14  ;;  %v3489_v43 = vshrl.u32 %v26_v38, 7  ;;  %v2905_v44 = vld [vmem:[%s4378_s3 + $0x320] ss:$40 sps:$4 sm:$0xff]   ;;  %v2907_v46 = vld [vmem:[%s4378_s3 + $0x374] ss:$40 sps:$4 sm:$0xff]  }
  0x10   :  { %1059 = vmatpush1.bf16.msra.mxu1 %v2864_v15  ;;  %1019 = vmatprep.subr.bf16.mxu0 %v2865_v16  ;;  %v2906_v45 = vld [vmem:[%s4378_s3 + $0x328] ss:$40 sps:$4 sm:$0xff]   ;;  %v2909_v47 = vld [vmem:[%s4378_s3 + $0x37c] ss:$40 sps:$4 sm:$0xff]   ;;  %v2912_v50 = vld [vmem:[%s4378_s3 + $0x378] ss:$40 sps:$4 sm:$0xff]  }
  0x11   :  { %1060 = vmatprep.subr.bf16.mxu1 %v2867_v17  ;;  %v32_v48 = vsub.s32 1, %v3489_v43  ;;  %v2911_v49 = vld [vmem:[%s4378_s3 + $0x370] ss:$40 sps:$4 sm:$0xff]   ;;  %v21_v51 = vld [vmem:[%s4379_s0] sm:$0x3]  ;;  %v28_v3 = vsub.s32 0, %v3489_v43 }
  0x12   :  { %v22_v52 = vld [vmem:[%s4380_s1] sm:$0x3]  ;;  %v2913_v54 = vld [vmem:[%s4378_s3 + $0x3c4] ss:$40 sps:$4 sm:$0xff]   ;;  %v2918_v60 = vld [vmem:[%s4378_s3 + $0x3c8] ss:$40 sps:$4 sm:$0xff]  }
  0x13   :  { %1020 = vmatpush1.bf16.msra.mxu0 %v2869_v18  ;;  %v2504_v53 = vld.sshfl [vmem:[%s4381_s2] sm:$0x33 pattern:$0x76325410]  ;;  %v23_v55 = vmul.f32 %v22_v52, %v21_v51  ;;  %v2915_v57 = vld [vmem:[%s4378_s3 + $0x3cc] ss:$40 sps:$4 sm:$0xff]  }
  0x14   :  { %1061 = vmatpush1.bf16.msra.mxu1 %v2870_v19  ;;  %1021 = vmatprep.subr.bf16.mxu0 %v2871_v20  ;;  %v44_v56 = vcombine.high %v2504_v53, %v2504_v53  ;;  %v2917_v59 = vld [vmem:[%s4378_s3 + $0x3c0] ss:$40 sps:$4 sm:$0xff]   ;;  %v2919_v61 = vld [vmem:[%s4378_s3 + $0x414] ss:$40 sps:$4 sm:$0xff]   ;;  %v2923_v1 = vld [vmem:[%s4378_s3 + $0x410] ss:$40 sps:$4 sm:$0xff]  }
  0x15   :  { %1062 = vmatprep.subr.bf16.mxu1 %v2873_v21  ;;  %v33_v58 = vrot.slane %v23_v55, %v32_v48  ;;  %v2921_v63 = vld [vmem:[%s4378_s3 + $0x41c] ss:$40 sps:$4 sm:$0xff]   ;;  %v2924_v2 = vld [vmem:[%s4378_s3 + $0x418] ss:$40 sps:$4 sm:$0xff]   ;;  %v2927_v5 = vld [vmem:[%s4378_s3 + $0x46c] ss:$40 sps:$4 sm:$0xff]   ;;  %v29_v8 = vrot.slane %v23_v55, %v28_v3 }
  0x16   :  { %v2925_v4 = vld [vmem:[%s4378_s3 + $0x464] ss:$40 sps:$4 sm:$0xff]   ;;  %v2929_v6 = vld [vmem:[%s4378_s3 + $0x460] ss:$40 sps:$4 sm:$0xff]   ;;  %v2931_v9 = vld [vmem:[%s4378_s3 + $0x4b4] ss:$40 sps:$4 sm:$0xff]  }
  0x17   :  { %1022 = vmatpush1.bf16.msra.mxu0 %v2875_v22  ;;  %v48_v62 = vadd.f32 %v44_v56, %v33_v58  ;;  %v2930_v7 = vld [vmem:[%s4378_s3 + $0x468] ss:$40 sps:$4 sm:$0xff]   ;;  %v2933_v10 = vld [vmem:[%s4378_s3 + $0x4bc] ss:$40 sps:$4 sm:$0xff]   ;;  %v2936_v12 = vld [vmem:[%s4378_s3 + $0x4b8] ss:$40 sps:$4 sm:$0xff]   ;;  %v47_v13 = vadd.f32 %v2504_v53, %v29_v8 }
  0x18   :  { %1063 = vmatpush1.bf16.msra.mxu1 %v2876_v23  ;;  %1023 = vmatprep.subr.bf16.mxu0 %v2877_v24  ;;  %v2935_v11 = vld [vmem:[%s4378_s3 + $0x4b0] ss:$40 sps:$4 sm:$0xff]   ;;  %v2939_v14 = vld [vmem:[%s4378_s3 + $0x14] ss:$40 sps:$4 sm:$0xff]   ;;  %v2945_v19 = vld [vmem:[%s4378_s3 + $0x64] ss:$40 sps:$4 sm:$0xff]  }
  0x19   :  { %1064 = vmatprep.subr.bf16.mxu1 %v2879_v25  ;;  %v3537_v0 = vpack.c.bf16 %v48_v62, %v48_v62  ;;  %v2942_v15 = vld [vmem:[%s4378_s3 + $0x1c] ss:$40 sps:$4 sm:$0xff]   ;;  %v3578_v16 = vpack.c.bf16 %v47_v13, %v47_v13  ;;  %v2937_v17 = vld [vmem:[%s4378_s3 + $0x10] ss:$40 sps:$4 sm:$0xff]   ;;  %v2948_v20 = vld [vmem:[%s4378_s3 + $0x6c] ss:$40 sps:$4 sm:$0xff]  }
  0x1a   :  { %v2940_v18 = vld [vmem:[%s4378_s3 + $0x18] ss:$40 sps:$4 sm:$0xff]   ;;  %v2946_v22 = vld [vmem:[%s4378_s3 + $0x68] ss:$40 sps:$4 sm:$0xff]   ;;  %v2951_v23 = vld [vmem:[%s4378_s3 + $0xb4] ss:$40 sps:$4 sm:$0xff]  }
  0x1b   :  { %1024 = vmatpush1.bf16.msra.mxu0 %v2881_v26  ;;  %1043 = vmatprep.mubr.bf16.mxu0 %v3537_v0  ;;  %v2943_v21 = vld [vmem:[%s4378_s3 + $0x60] ss:$40 sps:$4 sm:$0xff]   ;;  %v2954_v24 = vld [vmem:[%s4378_s3 + $0xbc] ss:$40 sps:$4 sm:$0xff]   ;;  %v2949_v25 = vld [vmem:[%s4378_s3 + $0xb0] ss:$40 sps:$4 sm:$0xff]  }
  0x1c   :  { %1065 = vmatpush1.bf16.msra.mxu1 %v2882_v27  ;;  %1025 = vmatprep.subr.bf16.mxu0 %v2883_v28  ;;  %v2952_v26 = vld [vmem:[%s4378_s3 + $0xb8] ss:$40 sps:$4 sm:$0xff]   ;;  %v2957_v27 = vld [vmem:[%s4378_s3 + $0x104] ss:$40 sps:$4 sm:$0xff]   ;;  %v2970_v38 = vld [vmem:[%s4378_s3 + $0x1a8] ss:$40 sps:$4 sm:$0xff]  }
  0x1d   :  { %1066 = vmatprep.subr.bf16.mxu1 %v2885_v29  ;;  %1084 = vmatprep.mubr.bf16.mxu1 %v3537_v0  ;;  %v2960_v28 = vld [vmem:[%s4378_s3 + $0x10c] ss:$40 sps:$4 sm:$0xff]   ;;  %v2955_v29 = vld [vmem:[%s4378_s3 + $0x100] ss:$40 sps:$4 sm:$0xff]   ;;  %v2997_v58 = vld [vmem:[%s4378_s3 + $0x330] ss:$40 sps:$4 sm:$0xff]  }
  0x1e   :  { %v2987_v48 = vld [vmem:[%s4378_s3 + $0x294] ss:$40 sps:$4 sm:$0xff]   ;;  %v2988_v51 = vld [vmem:[%s4378_s3 + $0x298] ss:$40 sps:$4 sm:$0xff]   ;;  %v2993_v52 = vld [vmem:[%s4378_s3 + $0x2e4] ss:$40 sps:$4 sm:$0xff]  }
  0x1f   :  { %1026 = vmatpush1.bf16.msra.mxu0 %v2887_v30  ;;  %v2958_v30 = vld [vmem:[%s4378_s3 + $0x108] ss:$40 sps:$4 sm:$0xff]   ;;  %v2996_v53 = vld [vmem:[%s4378_s3 + $0x2ec] ss:$40 sps:$4 sm:$0xff]  }
  0x20   :  { %1067 = vmatpush1.bf16.msra.mxu1 %v2888_v31  ;;  %1027 = vmatprep.subr.bf16.mxu0 %v2889_v32  ;;  %v2963_v31 = vld [vmem:[%s4378_s3 + $0x154] ss:$40 sps:$4 sm:$0xff]   ;;  %v2994_v55 = vld [vmem:[%s4378_s3 + $0x2e8] ss:$40 sps:$4 sm:$0xff]   ;;  %v3029_v13 = vld [vmem:[%s4378_s3 + $0x4c4] ss:$40 sps:$4 sm:$0xff]  }
  0x21   :  { %1068 = vmatprep.subr.bf16.mxu1 %v2891_v33  ;;  %v2966_v32 = vld [vmem:[%s4378_s3 + $0x15c] ss:$40 sps:$4 sm:$0xff]   ;;  %v2961_v33 = vld [vmem:[%s4378_s3 + $0x150] ss:$40 sps:$4 sm:$0xff]   ;;  %v3003_v62 = vld [vmem:[%s4378_s3 + $0x380] ss:$40 sps:$4 sm:$0xff]  }
  0x22   :  { %v2999_v56 = vld [vmem:[%s4378_s3 + $0x334] ss:$40 sps:$4 sm:$0xff]   ;;  %v3009_v3 = vld [vmem:[%s4378_s3 + $0x3d0] ss:$40 sps:$4 sm:$0xff]  }
  0x23   :  { %1028 = vmatpush1.bf16.msra.mxu0 %v2893_v34  ;;  %v2964_v34 = vld [vmem:[%s4378_s3 + $0x158] ss:$40 sps:$4 sm:$0xff]   ;;  %v3018_v8 = vld [vmem:[%s4378_s3 + $0x428] ss:$40 sps:$4 sm:$0xff]  }
  0x24   :  { %1069 = vmatpush1.bf16.msra.mxu1 %v2894_v35  ;;  %1029 = vmatprep.subr.bf16.mxu0 %v2895_v36  ;;  %v2969_v35 = vld [vmem:[%s4378_s3 + $0x1a4] ss:$40 sps:$4 sm:$0xff]  }
  0x25   :  { %1070 = vmatprep.subr.bf16.mxu1 %v2897_v37  ;;  %v2972_v36 = vld [vmem:[%s4378_s3 + $0x1ac] ss:$40 sps:$4 sm:$0xff]   ;;  %v2967_v37 = vld [vmem:[%s4378_s3 + $0x1a0] ss:$40 sps:$4 sm:$0xff]  }
  0x27   :  { %1030 = vmatpush1.bf16.msra.mxu0 %v2899_v39  ;;  %v2975_v39 = vld [vmem:[%s4378_s3 + $0x1f4] ss:$40 sps:$4 sm:$0xff]  }
  0x28   :  { %1071 = vmatpush1.bf16.msra.mxu1 %v2900_v40  ;;  %1031 = vmatprep.subr.bf16.mxu0 %v2901_v41  ;;  %v2978_v40 = vld [vmem:[%s4378_s3 + $0x1fc] ss:$40 sps:$4 sm:$0xff]   ;;  %v2973_v41 = vld [vmem:[%s4378_s3 + $0x1f0] ss:$40 sps:$4 sm:$0xff]  }
  0x29   :  { %1072 = vmatprep.subr.bf16.mxu1 %v2903_v42  ;;  %v2976_v42 = vld [vmem:[%s4378_s3 + $0x1f8] ss:$40 sps:$4 sm:$0xff]  }
  0x2b   :  { %1032 = vmatpush1.bf16.msra.mxu0 %v2905_v44  ;;  %v2981_v44 = vld [vmem:[%s4378_s3 + $0x244] ss:$40 sps:$4 sm:$0xff]  }
  0x2c   :  { %1073 = vmatpush1.bf16.msra.mxu1 %v2906_v45  ;;  %1033 = vmatprep.subr.bf16.mxu0 %v2907_v46  ;;  %v2984_v45 = vld [vmem:[%s4378_s3 + $0x24c] ss:$40 sps:$4 sm:$0xff]   ;;  %v2979_v46 = vld [vmem:[%s4378_s3 + $0x240] ss:$40 sps:$4 sm:$0xff]  }
  0x2d   :  { %1074 = vmatprep.subr.bf16.mxu1 %v2909_v47  ;;  %v2982_v47 = vld [vmem:[%s4378_s3 + $0x248] ss:$40 sps:$4 sm:$0xff]  }
  0x2f   :  { %1034 = vmatpush1.bf16.msra.mxu0 %v2911_v49  ;;  %v2990_v49 = vld [vmem:[%s4378_s3 + $0x29c] ss:$40 sps:$4 sm:$0xff]  }
  0x30   :  { %1075 = vmatpush1.bf16.msra.mxu1 %v2912_v50  ;;  %1035 = vmatprep.subr.bf16.mxu0 %v2913_v54  ;;  %v2985_v50 = vld [vmem:[%s4378_s3 + $0x290] ss:$40 sps:$4 sm:$0xff]   ;;  %v2991_v54 = vld [vmem:[%s4378_s3 + $0x2e0] ss:$40 sps:$4 sm:$0xff]  }
  0x31   :  { %1076 = vmatprep.subr.bf16.mxu1 %v2915_v57  ;;  %v3002_v57 = vld [vmem:[%s4378_s3 + $0x33c] ss:$40 sps:$4 sm:$0xff]  }
  0x33   :  { %1036 = vmatpush1.bf16.msra.mxu0 %v2917_v59  ;;  %v3000_v59 = vld [vmem:[%s4378_s3 + $0x338] ss:$40 sps:$4 sm:$0xff]  }
  0x34   :  { %1077 = vmatpush1.bf16.msra.mxu1 %v2918_v60  ;;  %1037 = vmatprep.subr.bf16.mxu0 %v2919_v61  ;;  %v3005_v60 = vld [vmem:[%s4378_s3 + $0x384] ss:$40 sps:$4 sm:$0xff]  }
  0x35   :  { %1078 = vmatprep.subr.bf16.mxu1 %v2921_v63  ;;  %v3008_v61 = vld [vmem:[%s4378_s3 + $0x38c] ss:$40 sps:$4 sm:$0xff]   ;;  %v3006_v63 = vld [vmem:[%s4378_s3 + $0x388] ss:$40 sps:$4 sm:$0xff]  }
  0x37   :  { %1038 = vmatpush1.bf16.msra.mxu0 %v2923_v1  ;;  %v3011_v1 = vld [vmem:[%s4378_s3 + $0x3d4] ss:$40 sps:$4 sm:$0xff]  }
  0x38   :  { %1079 = vmatpush1.bf16.msra.mxu1 %v2924_v2  ;;  %1039 = vmatprep.subr.bf16.mxu0 %v2925_v4  ;;  %v3014_v2 = vld [vmem:[%s4378_s3 + $0x3dc] ss:$40 sps:$4 sm:$0xff]   ;;  %v3012_v4 = vld [vmem:[%s4378_s3 + $0x3d8] ss:$40 sps:$4 sm:$0xff]  }
  0x39   :  { %1080 = vmatprep.subr.bf16.mxu1 %v2927_v5  ;;  %v3017_v5 = vld [vmem:[%s4378_s3 + $0x424] ss:$40 sps:$4 sm:$0xff]  }
  0x3b   :  { %1040 = vmatpush1.bf16.msra.mxu0 %v2929_v6  ;;  %v3020_v6 = vld [vmem:[%s4378_s3 + $0x42c] ss:$40 sps:$4 sm:$0xff]  }
  0x3c   :  { %1081 = vmatpush1.bf16.msra.mxu1 %v2930_v7  ;;  %1041 = vmatprep.subr.bf16.mxu0 %v2931_v9  ;;  %v3015_v7 = vld [vmem:[%s4378_s3 + $0x420] ss:$40 sps:$4 sm:$0xff]   ;;  %v3023_v9 = vld [vmem:[%s4378_s3 + $0x474] ss:$40 sps:$4 sm:$0xff]  }
  0x3d   :  { %1082 = vmatprep.subr.bf16.mxu1 %v2933_v10  ;;  %v3026_v10 = vld [vmem:[%s4378_s3 + $0x47c] ss:$40 sps:$4 sm:$0xff]  }
  0x3f   :  { %1042 = vmatpush1.bf16.msra.mxu0 %v2935_v11  ;;  %v3021_v11 = vld [vmem:[%s4378_s3 + $0x470] ss:$40 sps:$4 sm:$0xff]  }
  0x40   :  { %1083 = vmatpush1.bf16.msra.mxu1 %v2936_v12  ;;  %1093 = vmatprep.subr.bf16.mxu0 %v2939_v14  ;;  %v3024_v12 = vld [vmem:[%s4378_s3 + $0x478] ss:$40 sps:$4 sm:$0xff]   ;;  %v3032_v14 = vld [vmem:[%s4378_s3 + $0x4cc] ss:$40 sps:$4 sm:$0xff]  }
  0x41   :  { %1134 = vmatprep.subr.bf16.mxu1 %v2942_v15  ;;  %v3027_v15 = vld [vmem:[%s4378_s3 + $0x4c0] ss:$40 sps:$4 sm:$0xff]  }
  0x42   :  { %1044 = vmatmul.mubr.bf16.vlgmr.msra.gmra.mrb[0].mxu0 %v3578_v16 }
  0x43   :  { %1085 = vmatmul.mubr.bf16.vlgmr.msra.gmra.mrb[0].mxu1 %v3578_v16  ;;  %1094 = vmatpush1.bf16.msra.mxu0 %v2937_v17  ;;  %v3030_v17 = vld [vmem:[%s4378_s3 + $0x4c8] ss:$40 sps:$4 sm:$0xff]  }
  0x44   :  { %1135 = vmatpush1.bf16.msra.mxu1 %v2940_v18  ;;  %1095 = vmatprep.subr.bf16.mxu0 %v2945_v19  ;;  %v3035_v18 = vld [vmem:[%s4378_s3 + $0x24] ss:$40 sps:$4 sm:$0xff]   ;;  %v3033_v19 = vld [vmem:[%s4378_s3 + $0x20] ss:$40 sps:$4 sm:$0xff]  }
  0x45   :  { %1136 = vmatprep.subr.bf16.mxu1 %v2948_v20  ;;  %1125 = vmatprep.mubr.bf16.mxu0 %v3537_v0  ;;  %v3038_v20 = vld [vmem:[%s4378_s3 + $0x74] ss:$40 sps:$4 sm:$0xff]  }
  0x46   :  { %1166 = vmatprep.mubr.bf16.mxu1 %v3537_v0 }
  0x47   :  { %1096 = vmatpush1.bf16.msra.mxu0 %v2943_v21  ;;  %v3036_v21 = vld [vmem:[%s4378_s3 + $0x70] ss:$40 sps:$4 sm:$0xff]  }
  0x48   :  { %1137 = vmatpush1.bf16.msra.mxu1 %v2946_v22  ;;  %1097 = vmatprep.subr.bf16.mxu0 %v2951_v23  ;;  %v3041_v22 = vld [vmem:[%s4378_s3 + $0xc4] ss:$40 sps:$4 sm:$0xff]   ;;  %v3039_v23 = vld [vmem:[%s4378_s3 + $0xc0] ss:$40 sps:$4 sm:$0xff]  }
  0x49   :  { %1138 = vmatprep.subr.bf16.mxu1 %v2954_v24  ;;  %v3044_v24 = vld [vmem:[%s4378_s3 + $0x114] ss:$40 sps:$4 sm:$0xff]  }
  0x4b   :  { %1098 = vmatpush1.bf16.msra.mxu0 %v2949_v25  ;;  %v3047_v25 = vld [vmem:[%s4378_s3 + $0x164] ss:$40 sps:$4 sm:$0xff]  }
  0x4c   :  { %1139 = vmatpush1.bf16.msra.mxu1 %v2952_v26  ;;  %1099 = vmatprep.subr.bf16.mxu0 %v2957_v27  ;;  %v3045_v26 = vld [vmem:[%s4378_s3 + $0x160] ss:$40 sps:$4 sm:$0xff]   ;;  %v3050_v27 = vld [vmem:[%s4378_s3 + $0x1b4] ss:$40 sps:$4 sm:$0xff]  }
  0x4d   :  { %1140 = vmatprep.subr.bf16.mxu1 %v2960_v28  ;;  %v3048_v28 = vld [vmem:[%s4378_s3 + $0x1b0] ss:$40 sps:$4 sm:$0xff]  }
  0x4f   :  { %1100 = vmatpush1.bf16.msra.mxu0 %v2955_v29  ;;  %v3053_v29 = vld [vmem:[%s4378_s3 + $0x204] ss:$40 sps:$4 sm:$0xff]  }
  0x50   :  { %1141 = vmatpush1.bf16.msra.mxu1 %v2958_v30  ;;  %1101 = vmatprep.subr.bf16.mxu0 %v2963_v31  ;;  %v3051_v30 = vld [vmem:[%s4378_s3 + $0x200] ss:$40 sps:$4 sm:$0xff]   ;;  %v3056_v31 = vld [vmem:[%s4378_s3 + $0x254] ss:$40 sps:$4 sm:$0xff]  }
  0x51   :  { %1142 = vmatprep.subr.bf16.mxu1 %v2966_v32  ;;  %v3081_v32 = vld [vmem:[%s4382_s4] ss:$16 sps:$4 sm:$0xff]  }
  0x53   :  { %1102 = vmatpush1.bf16.msra.mxu0 %v2961_v33  ;;  %v3083_v33 = vld [vmem:[%s4382_s4 + $0x4] ss:$16 sps:$4 sm:$0xff]  }
  0x54   :  { %1143 = vmatpush1.bf16.msra.mxu1 %v2964_v34  ;;  %1103 = vmatprep.subr.bf16.mxu0 %v2969_v35  ;;  %v3054_v34 = vld [vmem:[%s4378_s3 + $0x250] ss:$40 sps:$4 sm:$0xff]   ;;  %v3059_v35 = vld [vmem:[%s4378_s3 + $0x2a4] ss:$40 sps:$4 sm:$0xff]  }
  0x55   :  { %1144 = vmatprep.subr.bf16.mxu1 %v2972_v36  ;;  %v3089_v36 = vld [vmem:[%s4382_s4 + $0x24] ss:$16 sps:$4 sm:$0xff]  }
  0x57   :  { %1104 = vmatpush1.bf16.msra.mxu0 %v2967_v37  ;;  %v3087_v37 = vld [vmem:[%s4382_s4 + $0x20] ss:$16 sps:$4 sm:$0xff]  }
  0x58   :  { %1145 = vmatpush1.bf16.msra.mxu1 %v2970_v38  ;;  %1105 = vmatprep.subr.bf16.mxu0 %v2975_v39  ;;  %v3057_v38 = vld [vmem:[%s4378_s3 + $0x2a0] ss:$40 sps:$4 sm:$0xff]   ;;  %v3095_v39 = vld [vmem:[%s4382_s4 + $0x44] ss:$16 sps:$4 sm:$0xff]  }
  0x59   :  { %1146 = vmatprep.subr.bf16.mxu1 %v2978_v40  ;;  %v3062_v40 = vld [vmem:[%s4378_s3 + $0x2f4] ss:$40 sps:$4 sm:$0xff]  }
  0x5b   :  { %1106 = vmatpush1.bf16.msra.mxu0 %v2973_v41  ;;  %v3093_v41 = vld [vmem:[%s4382_s4 + $0x40] ss:$16 sps:$4 sm:$0xff]  }
  0x5c   :  { %1147 = vmatpush1.bf16.msra.mxu1 %v2976_v42  ;;  %1107 = vmatprep.subr.bf16.mxu0 %v2981_v44  ;;  %v3101_v42 = vld [vmem:[%s4382_s4 + $0x64] ss:$16 sps:$4 sm:$0xff]   ;;  %v3060_v44 = vld [vmem:[%s4378_s3 + $0x2f0] ss:$40 sps:$4 sm:$0xff]  }
  0x5d   :  { %1148 = vmatprep.subr.bf16.mxu1 %v2984_v45  ;;  %v3065_v45 = vld [vmem:[%s4378_s3 + $0x344] ss:$40 sps:$4 sm:$0xff]  }
  0x5f   :  { %1108 = vmatpush1.bf16.msra.mxu0 %v2979_v46  ;;  %v3099_v46 = vld [vmem:[%s4382_s4 + $0x60] ss:$16 sps:$4 sm:$0xff]  }
  0x60   :  { %1149 = vmatpush1.bf16.msra.mxu1 %v2982_v47  ;;  %1109 = vmatprep.subr.bf16.mxu0 %v2987_v48  ;;  %v3107_v47 = vld [vmem:[%s4382_s4 + $0x84] ss:$16 sps:$4 sm:$0xff]   ;;  %v3063_v48 = vld [vmem:[%s4378_s3 + $0x340] ss:$40 sps:$4 sm:$0xff]  }
  0x61   :  { %1150 = vmatprep.subr.bf16.mxu1 %v2990_v49  ;;  %v3068_v49 = vld [vmem:[%s4378_s3 + $0x394] ss:$40 sps:$4 sm:$0xff]  }
  0x63   :  { %1110 = vmatpush1.bf16.msra.mxu0 %v2985_v50  ;;  %v3105_v50 = vld [vmem:[%s4382_s4 + $0x80] ss:$16 sps:$4 sm:$0xff]  }
  0x64   :  { %1151 = vmatpush1.bf16.msra.mxu1 %v2988_v51  ;;  %1111 = vmatprep.subr.bf16.mxu0 %v2993_v52  ;;  %v3113_v51 = vld [vmem:[%s4382_s4 + $0xa4] ss:$16 sps:$4 sm:$0xff]   ;;  %v3066_v52 = vld [vmem:[%s4378_s3 + $0x390] ss:$40 sps:$4 sm:$0xff]  }
  0x65   :  { %1152 = vmatprep.subr.bf16.mxu1 %v2996_v53  ;;  %v3071_v53 = vld [vmem:[%s4378_s3 + $0x3e4] ss:$40 sps:$4 sm:$0xff]  }
  0x67   :  { %1112 = vmatpush1.bf16.msra.mxu0 %v2991_v54  ;;  %v3111_v54 = vld [vmem:[%s4382_s4 + $0xa0] ss:$16 sps:$4 sm:$0xff]  }
  0x68   :  { %1153 = vmatpush1.bf16.msra.mxu1 %v2994_v55  ;;  %1113 = vmatprep.subr.bf16.mxu0 %v2999_v56  ;;  %v3119_v55 = vld [vmem:[%s4382_s4 + $0xc4] ss:$16 sps:$4 sm:$0xff]   ;;  %v3069_v56 = vld [vmem:[%s4378_s3 + $0x3e0] ss:$40 sps:$4 sm:$0xff]  }
  0x69   :  { %1154 = vmatprep.subr.bf16.mxu1 %v3002_v57  ;;  %v3074_v57 = vld [vmem:[%s4378_s3 + $0x434] ss:$40 sps:$4 sm:$0xff]  }
  0x6b   :  { %1114 = vmatpush1.bf16.msra.mxu0 %v2997_v58  ;;  %v3117_v58 = vld [vmem:[%s4382_s4 + $0xc0] ss:$16 sps:$4 sm:$0xff]  }
  0x6c   :  { %1155 = vmatpush1.bf16.msra.mxu1 %v3000_v59  ;;  %1115 = vmatprep.subr.bf16.mxu0 %v3005_v60  ;;  %v3125_v59 = vld [vmem:[%s4382_s4 + $0xe4] ss:$16 sps:$4 sm:$0xff]   ;;  %v3072_v60 = vld [vmem:[%s4378_s3 + $0x430] ss:$40 sps:$4 sm:$0xff]  }
  0x6d   :  { %1156 = vmatprep.subr.bf16.mxu1 %v3008_v61  ;;  %v3077_v61 = vld [vmem:[%s4378_s3 + $0x484] ss:$40 sps:$4 sm:$0xff]  }
  0x6f   :  { %1116 = vmatpush1.bf16.msra.mxu0 %v3003_v62  ;;  %v3075_v62 = vld [vmem:[%s4378_s3 + $0x480] ss:$40 sps:$4 sm:$0xff]  }
  0x70   :  { %1157 = vmatpush1.bf16.msra.mxu1 %v3006_v63  ;;  %1117 = vmatprep.subr.bf16.mxu0 %v3011_v1  ;;  %v3123_v63 = vld [vmem:[%s4382_s4 + $0xe0] ss:$16 sps:$4 sm:$0xff]   ;;  %v3080_v1 = vld [vmem:[%s4378_s3 + $0x4d4] ss:$40 sps:$4 sm:$0xff]  }
  0x71   :  { %1158 = vmatprep.subr.bf16.mxu1 %v3014_v2  ;;  %v3131_v2 = vld [vmem:[%s4382_s4 + $0x104] ss:$16 sps:$4 sm:$0xff]  }
  0x73   :  { %1118 = vmatpush1.bf16.msra.mxu0 %v3009_v3  ;;  %v3129_v3 = vld [vmem:[%s4382_s4 + $0x100] ss:$16 sps:$4 sm:$0xff]  }
  0x74   :  { %1159 = vmatpush1.bf16.msra.mxu1 %v3012_v4  ;;  %1119 = vmatprep.subr.bf16.mxu0 %v3017_v5  ;;  %v3137_v4 = vld [vmem:[%s4382_s4 + $0x124] ss:$16 sps:$4 sm:$0xff]   ;;  %v3078_v5 = vld [vmem:[%s4378_s3 + $0x4d0] ss:$40 sps:$4 sm:$0xff]  }
  0x75   :  { %1160 = vmatprep.subr.bf16.mxu1 %v3020_v6  ;;  %v3086_v6 = vld [vmem:[%s4382_s4 + $0xc] ss:$16 sps:$4 sm:$0xff]  }
  0x77   :  { %1120 = vmatpush1.bf16.msra.mxu0 %v3015_v7  ;;  %v3135_v7 = vld [vmem:[%s4382_s4 + $0x120] ss:$16 sps:$4 sm:$0xff]  }
  0x78   :  { %1161 = vmatpush1.bf16.msra.mxu1 %v3018_v8  ;;  %1121 = vmatprep.subr.bf16.mxu0 %v3023_v9  ;;  %v3143_v8 = vld [vmem:[%s4382_s4 + $0x144] ss:$16 sps:$4 sm:$0xff]   ;;  %v3084_v9 = vld [vmem:[%s4382_s4 + $0x8] ss:$16 sps:$4 sm:$0xff]  }
  0x79   :  { %1162 = vmatprep.subr.bf16.mxu1 %v3026_v10  ;;  %v3092_v10 = vld [vmem:[%s4382_s4 + $0x2c] ss:$16 sps:$4 sm:$0xff]  }
  0x7b   :  { %1122 = vmatpush1.bf16.msra.mxu0 %v3021_v11  ;;  %v3141_v11 = vld [vmem:[%s4382_s4 + $0x140] ss:$16 sps:$4 sm:$0xff]  }
  0x7c   :  { %1163 = vmatpush1.bf16.msra.mxu1 %v3024_v12  ;;  %1123 = vmatprep.subr.bf16.mxu0 %v3029_v13  ;;  %v3090_v12 = vld [vmem:[%s4382_s4 + $0x28] ss:$16 sps:$4 sm:$0xff]   ;;  %v3098_v13 = vld [vmem:[%s4382_s4 + $0x4c] ss:$16 sps:$4 sm:$0xff]  }
  0x7d   :  { %1164 = vmatprep.subr.bf16.mxu1 %v3032_v14  ;;  %v3096_v14 = vld [vmem:[%s4382_s4 + $0x48] ss:$16 sps:$4 sm:$0xff]  }
  0x7f   :  { %1124 = vmatpush1.bf16.msra.mxu0 %v3027_v15  ;;  %v3104_v15 = vld [vmem:[%s4382_s4 + $0x6c] ss:$16 sps:$4 sm:$0xff]  }
  0x80   :  { %1165 = vmatpush1.bf16.msra.mxu1 %v3030_v17  ;;  %1175 = vmatprep.subr.bf16.mxu0 %v3035_v18  ;;  %v3110_v17 = vld [vmem:[%s4382_s4 + $0x8c] ss:$16 sps:$4 sm:$0xff]   ;;  %v3108_v18 = vld [vmem:[%s4382_s4 + $0x88] ss:$16 sps:$4 sm:$0xff]  }
  0x81   :  { %2231 = vmatprep.subr.bf16.mxu1 %v3083_v33  ;;  %v3140_v33 = vld [vmem:[%s4382_s4 + $0x12c] ss:$16 sps:$4 sm:$0xff]  }
  0x82   :  { %1126 = vmatmul.mubr.bf16.vlgmr.msra.gmra.mrb[4].mxu0 %v3578_v16 }
  0x83   :  { %1167 = vmatmul.mubr.bf16.vlgmr.msra.gmra.mrb[4].mxu1 %v3578_v16  ;;  %1176 = vmatpush1.bf16.msra.mxu0 %v3033_v19  ;;  %v3116_v19 = vld [vmem:[%s4382_s4 + $0xac] ss:$16 sps:$4 sm:$0xff]  }
  0x84   :  { %1207 = vmatprep.mubr.bf16.mxu0 %v3537_v0  ;;  %1177 = vmatprep.subr.bf16.mxu0 %v3038_v20  ;;  %v3042_v0 = vld [vmem:[%s4378_s3 + $0x110] ss:$40 sps:$4 sm:$0xff]  }
  0x85   :  { %2232 = vmatpush1.bf16.msra.mxu1 %v3081_v32  ;;  %v3114_v20 = vld [vmem:[%s4382_s4 + $0xa8] ss:$16 sps:$4 sm:$0xff]  }
  0x86   :  { %2233 = vmatprep.subr.bf16.mxu1 %v3089_v36  ;;  %v3132_v32 = vld [vmem:[%s4382_s4 + $0x108] ss:$16 sps:$4 sm:$0xff]  }
  0x87   :  { %1178 = vmatpush1.bf16.msra.mxu0 %v3036_v21  ;;  %v3122_v21 = vld [vmem:[%s4382_s4 + $0xcc] ss:$16 sps:$4 sm:$0xff]   ;;  %v3138_v36 = vld [vmem:[%s4382_s4 + $0x128] ss:$16 sps:$4 sm:$0xff]  }
  0x88   :  { %1179 = vmatprep.subr.bf16.mxu0 %v3041_v22  ;;  %v3149_v22 = vld [vmem:[%s4382_s4 + $0x164] ss:$16 sps:$4 sm:$0xff]  }
  0x89   :  { %2234 = vmatpush1.bf16.msra.mxu1 %v3087_v37  ;;  %v3146_v37 = vld [vmem:[%s4382_s4 + $0x14c] ss:$16 sps:$4 sm:$0xff]  }
  0x8a   :  { %2235 = vmatprep.subr.bf16.mxu1 %v3095_v39  ;;  %v3144_v39 = vld [vmem:[%s4382_s4 + $0x148] ss:$16 sps:$4 sm:$0xff]  }
  0x8b   :  { %1180 = vmatpush1.bf16.msra.mxu0 %v3039_v23  ;;  %v3120_v23 = vld [vmem:[%s4382_s4 + $0xc8] ss:$16 sps:$4 sm:$0xff]  }
  0x8c   :  { %1181 = vmatprep.subr.bf16.mxu0 %v3044_v24  ;;  %v3147_v24 = vld [vmem:[%s4382_s4 + $0x160] ss:$16 sps:$4 sm:$0xff]  }
  0x8d   :  { %2236 = vmatpush1.bf16.msra.mxu1 %v3093_v41  ;;  %v3179_v41 = vld [vmem:[%s4382_s4 + $0x204] ss:$16 sps:$4 sm:$0xff]  }
  0x8e   :  { %2237 = vmatprep.subr.bf16.mxu1 %v3101_v42  ;;  %v3150_v42 = vld [vmem:[%s4382_s4 + $0x168] ss:$16 sps:$4 sm:$0xff]  }
  0x8f   :  { %1182 = vmatpush1.bf16.msra.mxu0 %v3042_v0  ;;  %v3128_v0 = vld [vmem:[%s4382_s4 + $0xec] ss:$16 sps:$4 sm:$0xff]  }
  0x90   :  { %1183 = vmatprep.subr.bf16.mxu0 %v3047_v25  ;;  %v3155_v25 = vld [vmem:[%s4382_s4 + $0x184] ss:$16 sps:$4 sm:$0xff]  }
  0x91   :  { %2238 = vmatpush1.bf16.msra.mxu1 %v3099_v46  ;;  %v3164_v46 = vld [vmem:[%s4382_s4 + $0x1ac] ss:$16 sps:$4 sm:$0xff]  }
  0x92   :  { %2239 = vmatprep.subr.bf16.mxu1 %v3107_v47  ;;  %v3162_v47 = vld [vmem:[%s4382_s4 + $0x1a8] ss:$16 sps:$4 sm:$0xff]  }
  0x93   :  { %1184 = vmatpush1.bf16.msra.mxu0 %v3045_v26  ;;  %v3126_v26 = vld [vmem:[%s4382_s4 + $0xe8] ss:$16 sps:$4 sm:$0xff]  }
  0x94   :  { %1185 = vmatprep.subr.bf16.mxu0 %v3050_v27  ;;  %v3153_v27 = vld [vmem:[%s4382_s4 + $0x180] ss:$16 sps:$4 sm:$0xff]  }
  0x95   :  { %2240 = vmatpush1.bf16.msra.mxu1 %v3105_v50  ;;  %v3176_v50 = vld [vmem:[%s4382_s4 + $0x1ec] ss:$16 sps:$4 sm:$0xff]  }
  0x96   :  { %2241 = vmatprep.subr.bf16.mxu1 %v3113_v51  ;;  %v3174_v51 = vld [vmem:[%s4382_s4 + $0x1e8] ss:$16 sps:$4 sm:$0xff]  }
  0x97   :  { %1186 = vmatpush1.bf16.msra.mxu0 %v3048_v28  ;;  %v3134_v28 = vld [vmem:[%s4382_s4 + $0x10c] ss:$16 sps:$4 sm:$0xff]  }
  0x98   :  { %1187 = vmatprep.subr.bf16.mxu0 %v3053_v29  ;;  %v3161_v29 = vld [vmem:[%s4382_s4 + $0x1a4] ss:$16 sps:$4 sm:$0xff]  }
  0x99   :  { %2242 = vmatpush1.bf16.msra.mxu1 %v3111_v54 }
  0x9a   :  { %2243 = vmatprep.subr.bf16.mxu1 %v3119_v55 }
  0x9b   :  { %1188 = vmatpush1.bf16.msra.mxu0 %v3051_v30  ;;  %v3159_v30 = vld [vmem:[%s4382_s4 + $0x1a0] ss:$16 sps:$4 sm:$0xff]  }
  0x9c   :  { %1189 = vmatprep.subr.bf16.mxu0 %v3056_v31  ;;  %v3167_v31 = vld [vmem:[%s4382_s4 + $0x1c4] ss:$16 sps:$4 sm:$0xff]  }
  0x9d   :  { %2244 = vmatpush1.bf16.msra.mxu1 %v3117_v58 }
  0x9e   :  { %2245 = vmatprep.subr.bf16.mxu1 %v3125_v59 }
  0x9f   :  { %1190 = vmatpush1.bf16.msra.mxu0 %v3054_v34  ;;  %v3165_v34 = vld [vmem:[%s4382_s4 + $0x1c0] ss:$16 sps:$4 sm:$0xff]  }
  0xa0   :  { %1191 = vmatprep.subr.bf16.mxu0 %v3059_v35  ;;  %v3173_v35 = vld [vmem:[%s4382_s4 + $0x1e4] ss:$16 sps:$4 sm:$0xff]  }
  0xa1   :  { %2246 = vmatpush1.bf16.msra.mxu1 %v3123_v63 }
  0xa2   :  { %2247 = vmatprep.subr.bf16.mxu1 %v3131_v2 }
  0xa3   :  { %1192 = vmatpush1.bf16.msra.mxu0 %v3057_v38  ;;  %v3171_v38 = vld [vmem:[%s4382_s4 + $0x1e0] ss:$16 sps:$4 sm:$0xff]  }
  0xa4   :  { %1193 = vmatprep.subr.bf16.mxu0 %v3062_v40  ;;  %v3152_v40 = vld [vmem:[%s4382_s4 + $0x16c] ss:$16 sps:$4 sm:$0xff]  }
  0xa5   :  { %2248 = vmatpush1.bf16.msra.mxu1 %v3129_v3 }
  0xa6   :  { %2249 = vmatprep.subr.bf16.mxu1 %v3137_v4 }
  0xa7   :  { %1194 = vmatpush1.bf16.msra.mxu0 %v3060_v44  ;;  %v3158_v44 = vld [vmem:[%s4382_s4 + $0x18c] ss:$16 sps:$4 sm:$0xff]  }
  0xa8   :  { %1195 = vmatprep.subr.bf16.mxu0 %v3065_v45  ;;  %v3156_v45 = vld [vmem:[%s4382_s4 + $0x188] ss:$16 sps:$4 sm:$0xff]  }
  0xa9   :  { %2250 = vmatpush1.bf16.msra.mxu1 %v3135_v7 }
  0xaa   :  { %2251 = vmatprep.subr.bf16.mxu1 %v3143_v8 }
  0xab   :  { %1196 = vmatpush1.bf16.msra.mxu0 %v3063_v48  ;;  %v3170_v48 = vld [vmem:[%s4382_s4 + $0x1cc] ss:$16 sps:$4 sm:$0xff]  }
  0xac   :  { %1197 = vmatprep.subr.bf16.mxu0 %v3068_v49  ;;  %v3168_v49 = vld [vmem:[%s4382_s4 + $0x1c8] ss:$16 sps:$4 sm:$0xff]  }
  0xad   :  { %2252 = vmatpush1.bf16.msra.mxu1 %v3141_v11 }
  0xae   :  { %2253 = vmatprep.subr.bf16.mxu1 %v3149_v22 }
  0xaf   :  { %1198 = vmatpush1.bf16.msra.mxu0 %v3066_v52  ;;  %v3182_v52 = vld [vmem:[%s4382_s4 + $0x20c] ss:$16 sps:$4 sm:$0xff]  }
  0xb0   :  { %1199 = vmatprep.subr.bf16.mxu0 %v3071_v53 }
  0xb1   :  { %2254 = vmatpush1.bf16.msra.mxu1 %v3147_v24 }
  0xb2   :  { %2255 = vmatprep.subr.bf16.mxu1 %v3155_v25 }
  0xb3   :  { %1200 = vmatpush1.bf16.msra.mxu0 %v3069_v56 }
  0xb4   :  { %1201 = vmatprep.subr.bf16.mxu0 %v3074_v57 }
  0xb5   :  { %2256 = vmatpush1.bf16.msra.mxu1 %v3153_v27 }
  0xb6   :  { %2257 = vmatprep.subr.bf16.mxu1 %v3161_v29  ;;  %v3188_v29 = vld [vmem:[%s4382_s4 + $0x22c] ss:$16 sps:$4 sm:$0xff]  }
  0xb7   :  { %1202 = vmatpush1.bf16.msra.mxu0 %v3072_v60 }
  0xb8   :  { %1203 = vmatprep.subr.bf16.mxu0 %v3077_v61 }
  0xb9   :  { %2258 = vmatpush1.bf16.msra.mxu1 %v3159_v30  ;;  %v3183_v30 = vld [vmem:[%s4382_s4 + $0x220] ss:$16 sps:$4 sm:$0xff]  }
  0xba   :  { %2259 = vmatprep.subr.bf16.mxu1 %v3167_v31  ;;  %v3186_v31 = vld [vmem:[%s4382_s4 + $0x228] ss:$16 sps:$4 sm:$0xff]  }
  0xbb   :  { %1204 = vmatpush1.bf16.msra.mxu0 %v3075_v62 }
  0xbc   :  { %1205 = vmatprep.subr.bf16.mxu0 %v3080_v1 }
  0xbd   :  { %2260 = vmatpush1.bf16.msra.mxu1 %v3165_v34  ;;  %v3189_v34 = vld [vmem:[%s4382_s4 + $0x240] ss:$16 sps:$4 sm:$0xff]  }
  0xbe   :  { %2261 = vmatprep.subr.bf16.mxu1 %v3173_v35  ;;  %v3192_v35 = vld [vmem:[%s4382_s4 + $0x248] ss:$16 sps:$4 sm:$0xff]  }
  0xbf   :  { %1206 = vmatpush1.bf16.msra.mxu0 %v3078_v5 }
  0xc0   :  { %2354 = vmatprep.subr.bf16.mxu0 %v3086_v6 }
  0xc1   :  { %2262 = vmatpush1.bf16.msra.mxu1 %v3171_v38  ;;  %v3195_v38 = vld [vmem:[%s4382_s4 + $0x260] ss:$16 sps:$4 sm:$0xff]  }
  0xc2   :  { %1208 = vmatmul.mubr.bf16.vlgmr.msra.gmra.mrb[8].mxu0 %v3578_v16  ;;  %v3102_v16 = vld [vmem:[%s4382_s4 + $0x68] ss:$16 sps:$4 sm:$0xff]   ;;  %2272 = vmatprep.subr.bf16.mxu1 %v3179_v41  ;;  %v3206_v41 = vld [vmem:[%s4382_s4 + $0x28c] ss:$16 sps:$4 sm:$0xff]  }
  0xc3   :  { %2355 = vmatpush1.bf16.msra.mxu0 %v3084_v9 }
  0xc4   :  { %2356 = vmatprep.subr.bf16.mxu0 %v3092_v10 }
  0xc7   :  { %2357 = vmatpush1.bf16.msra.mxu0 %v3090_v12 }
  0xc8   :  { %2358 = vmatprep.subr.bf16.mxu0 %v3098_v13 }
  0xcb   :  { %2359 = vmatpush1.bf16.msra.mxu0 %v3096_v14 }
  0xcc   :  { %2360 = vmatprep.subr.bf16.mxu0 %v3104_v15 }
  0xcf   :  { %2361 = vmatpush1.bf16.msra.mxu0 %v3102_v16 }
  0xd0   :  { %2362 = vmatprep.subr.bf16.mxu0 %v3110_v17 }
  0xd3   :  { %2363 = vmatpush1.bf16.msra.mxu0 %v3108_v18 }
  0xd4   :  { %2364 = vmatprep.subr.bf16.mxu0 %v3116_v19 }
  0xd7   :  { %2365 = vmatpush1.bf16.msra.mxu0 %v3114_v20 }
  0xd8   :  { %2366 = vmatprep.subr.bf16.mxu0 %v3122_v21 }
  0xdb   :  { %2367 = vmatpush1.bf16.msra.mxu0 %v3120_v23 }
  0xdc   :  { %2368 = vmatprep.subr.bf16.mxu0 %v3128_v0  ;;  %v3177_v0 = vld [vmem:[%s4382_s4 + $0x200] ss:$16 sps:$4 sm:$0xff]  }
  0xdf   :  { %2369 = vmatpush1.bf16.msra.mxu0 %v3126_v26  ;;  %v3180_v26 = vld [vmem:[%s4382_s4 + $0x208] ss:$16 sps:$4 sm:$0xff]  }
  0xe0   :  { %2370 = vmatprep.subr.bf16.mxu0 %v3134_v28  ;;  %v3185_v28 = vld [vmem:[%s4382_s4 + $0x224] ss:$16 sps:$4 sm:$0xff]  }
  0xe3   :  { %2371 = vmatpush1.bf16.msra.mxu0 %v3132_v32  ;;  %v3191_v32 = vld [vmem:[%s4382_s4 + $0x244] ss:$16 sps:$4 sm:$0xff]  }
  0xe4   :  { %2372 = vmatprep.subr.bf16.mxu0 %v3140_v33  ;;  %v3194_v33 = vld [vmem:[%s4382_s4 + $0x24c] ss:$16 sps:$4 sm:$0xff]  }
  0xe7   :  { %2373 = vmatpush1.bf16.msra.mxu0 %v3138_v36  ;;  %v3197_v36 = vld [vmem:[%s4382_s4 + $0x264] ss:$16 sps:$4 sm:$0xff]  }
  0xe8   :  { %2374 = vmatprep.subr.bf16.mxu0 %v3146_v37  ;;  %v3200_v37 = vld [vmem:[%s4382_s4 + $0x26c] ss:$16 sps:$4 sm:$0xff]  }
  0xeb   :  { %2375 = vmatpush1.bf16.msra.mxu0 %v3144_v39  ;;  %v3198_v39 = vld [vmem:[%s4382_s4 + $0x268] ss:$16 sps:$4 sm:$0xff]  }
  0xec   :  { %2376 = vmatprep.subr.bf16.mxu0 %v3152_v40  ;;  %v3203_v40 = vld [vmem:[%s4382_s4 + $0x284] ss:$16 sps:$4 sm:$0xff]  }
  0xef   :  { %2377 = vmatpush1.bf16.msra.mxu0 %v3150_v42  ;;  %v3201_v42 = vld [vmem:[%s4382_s4 + $0x280] ss:$16 sps:$4 sm:$0xff]  }
  0xf0   :  { %2378 = vmatprep.subr.bf16.mxu0 %v3158_v44  ;;  %v3204_v44 = vld [vmem:[%s4382_s4 + $0x288] ss:$16 sps:$4 sm:$0xff]  }
  0xf3   :  { %2379 = vmatpush1.bf16.msra.mxu0 %v3156_v45  ;;  %v3209_v45 = vld [vmem:[%s4382_s4 + $0x2a4] ss:$16 sps:$4 sm:$0xff]  }
  0xf4   :  { %2380 = vmatprep.subr.bf16.mxu0 %v3164_v46  ;;  %v3212_v46 = vld [vmem:[%s4382_s4 + $0x2ac] ss:$16 sps:$4 sm:$0xff]  }
  0xf7   :  { %2381 = vmatpush1.bf16.msra.mxu0 %v3162_v47  ;;  %v3207_v47 = vld [vmem:[%s4382_s4 + $0x2a0] ss:$16 sps:$4 sm:$0xff]  }
  0xf8   :  { %2382 = vmatprep.subr.bf16.mxu0 %v3170_v48  ;;  %v3210_v48 = vld [vmem:[%s4382_s4 + $0x2a8] ss:$16 sps:$4 sm:$0xff]  }
  0xfb   :  { %2383 = vmatpush1.bf16.msra.mxu0 %v3168_v49  ;;  %v3215_v49 = vld [vmem:[%s4382_s4 + $0x2c4] ss:$16 sps:$4 sm:$0xff]  }
  0xfc   :  { %2384 = vmatprep.subr.bf16.mxu0 %v3176_v50  ;;  %v3218_v50 = vld [vmem:[%s4382_s4 + $0x2cc] ss:$16 sps:$4 sm:$0xff]  }
  0xff   :  { %2385 = vmatpush1.bf16.msra.mxu0 %v3174_v51  ;;  %v3213_v51 = vld [vmem:[%s4382_s4 + $0x2c0] ss:$16 sps:$4 sm:$0xff]  }
 0x100   :  { %2395 = vmatprep.subr.bf16.mxu0 %v3182_v52  ;;  %v3216_v52 = vld [vmem:[%s4382_s4 + $0x2c8] ss:$16 sps:$4 sm:$0xff]  }
 0x115   :  { %v1045_v53 = vpop.f32.mrb[0].mxu0 }
 0x116   :  { %v1086_v54 = vpop.f32.mrb[0].mxu1  ;;  %v1047_v55 = vpop.f32.mrb[1].mxu0  ;;  %v1216_v4 = vmul.f32 %v1045_v53, %v1045_v53  ;;  %v3221_v53 = vld [vmem:[%s4382_s4 + $0x2e4] ss:$16 sps:$4 sm:$0xff]  }
 0x117   :  { %v4068_v56 = vpop.f32.mrb[1].mxu1  ;;  %v1049_v57 = vpop.f32.mrb[2].mxu0  ;;  %v1217_v63 = vmul.f32 %v1047_v55, %v1047_v55  ;;  %v1218_v5 = vmul.f32 %v1086_v54, %v1086_v54  ;;  %v3224_v54 = vld [vmem:[%s4382_s4 + $0x2ec] ss:$16 sps:$4 sm:$0xff]   ;;  %v3219_v55 = vld [vmem:[%s4382_s4 + $0x2e0] ss:$16 sps:$4 sm:$0xff]  }
 0x118   :  { %v1090_v58 = vpop.f32.mrb[2].mxu1  ;;  %v1050_v59 = vpop.f32.mrb[3].mxu0  ;;  %v3222_v57 = vld [vmem:[%s4382_s4 + $0x2e8] ss:$16 sps:$4 sm:$0xff]  }
 0x119   :  { %v1091_v60 = vpop.f32.mrb[3].mxu1  ;;  %v3227_v58 = vld [vmem:[%s4382_s4 + $0x304] ss:$16 sps:$4 sm:$0xff]   ;;  %v3230_v59 = vld [vmem:[%s4382_s4 + $0x30c] ss:$16 sps:$4 sm:$0xff]  }
 0x11a   :  { %v3225_v60 = vld [vmem:[%s4382_s4 + $0x300] ss:$16 sps:$4 sm:$0xff]  }
 0x155   :  { %v4070_v61 = vpop.f32.mrb[4].mxu0 }
 0x156   :  { %v1168_v62 = vpop.f32.mrb[4].mxu1  ;;  %v1129_v2 = vpop.f32.mrb[5].mxu0 }
 0x157   :  { %v1222_v1 = vmul.f32 %v1168_v62, %v1168_v62  ;;  %v1170_v3 = vpop.f32.mrb[5].mxu1  ;;  %v1221_v6 = vmul.f32 %v1129_v2, %v1129_v2  ;;  %v1131_v8 = vpop.f32.mrb[6].mxu0  ;;  %v3228_v62 = vld [vmem:[%s4382_s4 + $0x308] ss:$16 sps:$4 sm:$0xff]   ;;  %v3231_v2 = vld [vmem:[%s4382_s4 + $0x320] ss:$16 sps:$4 sm:$0xff]  }
 0x158   :  { %v1223_v7 = vmul.f32 %v1170_v3, %v1170_v3  ;;  %v1172_v9 = vpop.f32.mrb[6].mxu1  ;;  %v1132_v11 = vpop.f32.mrb[7].mxu0  ;;  %v3234_v3 = vld [vmem:[%s4382_s4 + $0x328] ss:$16 sps:$4 sm:$0xff]   ;;  %v3245_v8 = vld [vmem:[%s4382_s4 + $0x364] ss:$16 sps:$4 sm:$0xff]  }
 0x159   :  { %v1227_v10 = vadd.f32 %v1222_v1, %v1217_v63  ;;  %v1173_v12 = vpop.f32.mrb[7].mxu1  ;;  %v1226_v13 = vadd.f32 %v1221_v6, %v1216_v4  ;;  %v3233_v63 = vld [vmem:[%s4382_s4 + $0x324] ss:$16 sps:$4 sm:$0xff]   ;;  %v3236_v1 = vld [vmem:[%s4382_s4 + $0x32c] ss:$16 sps:$4 sm:$0xff]  }
 0x15a   :  { %v4072_v14 = vadd.f32 %v1223_v7, %v1218_v5  ;;  %v3239_v4 = vld [vmem:[%s4382_s4 + $0x344] ss:$16 sps:$4 sm:$0xff]   ;;  %v3242_v5 = vld [vmem:[%s4382_s4 + $0x34c] ss:$16 sps:$4 sm:$0xff]   ;;  %v3237_v6 = vld [vmem:[%s4382_s4 + $0x340] ss:$16 sps:$4 sm:$0xff]  }
 0x15b   :  { %3321 = vrsqrt.f32 %v1227_v10  ;;  %vm1240_vm0 = vcmp.eq.f32.partialorder %v1227_v10, inf  ;;  %v1243_v18 = vand.u32 2147483648, %v1227_v10  ;;  %vm1242_vm1 = vcmp.eq.f32.partialorder %v1227_v10, 0.0  ;;  %v3240_v7 = vld [vmem:[%s4382_s4 + $0x348] ss:$16 sps:$4 sm:$0xff]  }
 0x15c   :  { %3323 = vrsqrt.f32 %v1226_v13  ;;  %vm1233_vm2 = vcmp.eq.f32.partialorder %v1226_v13, inf  ;;  %v1236_v21 = vand.u32 2147483648, %v1226_v13  ;;  %vm1235_vm3 = vcmp.eq.f32.partialorder %v1226_v13, 0.0  ;;  %v3248_v9 = vld [vmem:[%s4382_s4 + $0x36c] ss:$16 sps:$4 sm:$0xff]  }
 0x15d   :  { %3325 = vrsqrt.f32 %v4072_v14  ;;  %v3243_v11 = vld [vmem:[%s4382_s4 + $0x360] ss:$16 sps:$4 sm:$0xff]   ;;  %v3246_v12 = vld [vmem:[%s4382_s4 + $0x368] ss:$16 sps:$4 sm:$0xff]   ;;  %vm1247_vm4 = vcmp.eq.f32.partialorder %v4072_v14, inf  ;;  %vm1249_vm6 = vcmp.eq.f32.partialorder %v4072_v14, 0.0 }
 0x165   :  { %v3322_v15 = vpop.eup %3321 }
 0x166   :  { %v3324_v16 = vpop.eup %3323  ;;  %v1239_v17 = vmul.f32 %v3322_v15, %v1227_v10 }
 0x167   :  { %v1232_v19 = vmul.f32 %v3324_v16, %v1226_v13 }
 0x168   :  { %v1241_v20 = vsel %vm1240_vm0, %v1227_v10, %v1239_v17  ;;  %v3251_v17 = vld [vmem:[%s4382_s4 + $0x384] ss:$16 sps:$4 sm:$0xff]  }
 0x169   :  { %v1244_v22 = vsel %vm1242_vm1, %v1243_v18, %v1241_v20  ;;  %v1234_v23 = vsel %vm1233_vm2, %v1226_v13, %v1232_v19  ;;  %v1219_v13 = vmul.f32 %v4068_v56, %v4068_v56  ;;  %v3254_v18 = vld [vmem:[%s4382_s4 + $0x38c] ss:$16 sps:$4 sm:$0xff]   ;;  %v1220_v19 = vmul.f32 %v4070_v61, %v4070_v61  ;;  %v3257_v61 = vld [vmem:[%s4382_s4 + $0x3a4] ss:$16 sps:$4 sm:$0xff]  }
 0x16a   :  { %v1267_v24 = vpack.c.bf16 %v1244_v22, %v1244_v22  ;;  %v1237_v25 = vsel %vm1235_vm3, %v1236_v21, %v1234_v23 }
 0x16b   :  { %v1266_v27 = vpack.c.bf16 %v1237_v25, %v1237_v25  ;;  %v3260_v25 = vld [vmem:[%s4382_s4 + $0x3ac] ss:$16 sps:$4 sm:$0xff]  }
 0x16c   :  { %2263 = vmatprep.mubr.bf16.mxu1 %v1267_v24  ;;  %2386 = vmatprep.mubr.bf16.mxu0 %v1267_v24  ;;  %v3249_v24 = vld [vmem:[%s4382_s4 + $0x380] ss:$16 sps:$4 sm:$0xff]  }
 0x16d   :  { %2264 = vmatmul.mubr.bf16.vlgmr.msra.gmra.mrb[8].mxu1 %v1266_v27  ;;  %2387 = vmatmul.mubr.bf16.vlgmr.msra.gmra.mrb[12].mxu0 %v1266_v27  ;;  %v3255_v27 = vld [vmem:[%s4382_s4 + $0x3a0] ss:$16 sps:$4 sm:$0xff]  }
 0x16e   :  { %2273 = vmatpush1.bf16.msra.mxu1 %v3177_v0  ;;  %2396 = vmatpush1.bf16.msra.mxu0 %v3180_v26  ;;  %v3252_v0 = vld [vmem:[%s4382_s4 + $0x388] ss:$16 sps:$4 sm:$0xff]   ;;  %v3326_v26 = vpop.eup %3325 }
 0x16f   :  { %2274 = vmatprep.subr.bf16.mxu1 %v3185_v28  ;;  %2397 = vmatprep.subr.bf16.mxu0 %v3188_v29  ;;  %v3258_v28 = vld [vmem:[%s4382_s4 + $0x3a8] ss:$16 sps:$4 sm:$0xff]   ;;  %v3263_v29 = vld [vmem:[%s4382_s4 + $0x3c4] ss:$16 sps:$4 sm:$0xff]  }
 0x172   :  { %2275 = vmatpush1.bf16.msra.mxu1 %v3183_v30  ;;  %2398 = vmatpush1.bf16.msra.mxu0 %v3186_v31  ;;  %v3266_v30 = vld [vmem:[%s4382_s4 + $0x3cc] ss:$16 sps:$4 sm:$0xff]   ;;  %v1246_v31 = vmul.f32 %v3326_v26, %v4072_v14 }
 0x173   :  { %2276 = vmatprep.subr.bf16.mxu1 %v3191_v32  ;;  %2399 = vmatprep.subr.bf16.mxu0 %v3194_v33  ;;  %v3261_v32 = vld [vmem:[%s4382_s4 + $0x3c0] ss:$16 sps:$4 sm:$0xff]   ;;  %v3264_v33 = vld [vmem:[%s4382_s4 + $0x3c8] ss:$16 sps:$4 sm:$0xff]  }
 0x176   :  { %2277 = vmatpush1.bf16.msra.mxu1 %v3189_v34  ;;  %2400 = vmatpush1.bf16.msra.mxu0 %v3192_v35  ;;  %v3269_v34 = vld [vmem:[%s4382_s4 + $0x3e4] ss:$16 sps:$4 sm:$0xff]   ;;  %v3272_v35 = vld [vmem:[%s4382_s4 + $0x3ec] ss:$16 sps:$4 sm:$0xff]  }
 0x177   :  { %2278 = vmatprep.subr.bf16.mxu1 %v3197_v36  ;;  %2401 = vmatprep.subr.bf16.mxu0 %v3200_v37  ;;  %v1248_v37 = vsel %vm1247_vm4, %v4072_v14, %v1246_v31 }
 0x17a   :  { %2279 = vmatpush1.bf16.msra.mxu1 %v3195_v38  ;;  %2402 = vmatpush1.bf16.msra.mxu0 %v3198_v39  ;;  %v3267_v38 = vld [vmem:[%s4382_s4 + $0x3e0] ss:$16 sps:$4 sm:$0xff]   ;;  %v3270_v39 = vld [vmem:[%s4382_s4 + $0x3e8] ss:$16 sps:$4 sm:$0xff]  }
 0x17b   :  { %2280 = vmatprep.subr.bf16.mxu1 %v3203_v40  ;;  %2403 = vmatprep.subr.bf16.mxu0 %v3206_v41  ;;  %v1250_v41 = vand.u32 2147483648, %v4072_v14  ;;  %v3276_v14 = vld [vmem:[%s4382_s4 + $0x420] ss:$16 sps:$4 sm:$0xff]  }
 0x17e   :  { %2281 = vmatpush1.bf16.msra.mxu1 %v3201_v42  ;;  %2404 = vmatpush1.bf16.msra.mxu0 %v3204_v44  ;;  %v3275_v44 = vld [vmem:[%s4382_s4 + $0x404] ss:$16 sps:$4 sm:$0xff]  }
 0x17f   :  { %2282 = vmatprep.subr.bf16.mxu1 %v3209_v45  ;;  %2405 = vmatprep.subr.bf16.mxu0 %v3212_v46  ;;  %v1251_v46 = vsel %vm1249_vm6, %v1250_v41, %v1248_v37 }
 0x182   :  { %2283 = vmatpush1.bf16.msra.mxu1 %v3207_v47  ;;  %2406 = vmatpush1.bf16.msra.mxu0 %v3210_v48 }
 0x183   :  { %2284 = vmatprep.subr.bf16.mxu1 %v3215_v49  ;;  %2407 = vmatprep.subr.bf16.mxu0 %v3218_v50  ;;  %v3273_v49 = vld [vmem:[%s4382_s4 + $0x400] ss:$16 sps:$4 sm:$0xff]   ;;  %v1268_v50 = vpack.c.bf16 %v1251_v46, %v1251_v46 }
 0x186   :  { %2285 = vmatpush1.bf16.msra.mxu1 %v3213_v51  ;;  %2408 = vmatpush1.bf16.msra.mxu0 %v3216_v52  ;;  %v3278_v51 = vld [vmem:[%s4382_s4 + $0x424] ss:$16 sps:$4 sm:$0xff]   ;;  %v3331_v52 = vmov 0  }
 0x187   :  { %2286 = vmatprep.subr.bf16.mxu1 %v3221_v53  ;;  %2409 = vmatprep.subr.bf16.mxu0 %v3224_v54  ;;  %v3281_v53 = vld [vmem:[%s4382_s4 + $0x444] ss:$16 sps:$4 sm:$0xff]   ;;  %v3279_v54 = vld [vmem:[%s4382_s4 + $0x440] ss:$16 sps:$4 sm:$0xff]  }
 0x18a   :  { %2287 = vmatpush1.bf16.msra.mxu1 %v3219_v55  ;;  %2410 = vmatpush1.bf16.msra.mxu0 %v3222_v57  ;;  %v3284_v55 = vld [vmem:[%s4382_s4 + $0x464] ss:$16 sps:$4 sm:$0xff]   ;;  %v3282_v57 = vld [vmem:[%s4382_s4 + $0x460] ss:$16 sps:$4 sm:$0xff]  }
 0x18b   :  { %2288 = vmatprep.subr.bf16.mxu1 %v3227_v58  ;;  %2411 = vmatprep.subr.bf16.mxu0 %v3230_v59  ;;  %v3287_v58 = vld [vmem:[%s4382_s4 + $0x484] ss:$16 sps:$4 sm:$0xff]   ;;  %v3285_v59 = vld [vmem:[%s4382_s4 + $0x480] ss:$16 sps:$4 sm:$0xff]  }
 0x18e   :  { %2289 = vmatpush1.bf16.msra.mxu1 %v3225_v60  ;;  %2412 = vmatpush1.bf16.msra.mxu0 %v3228_v62  ;;  %v3290_v60 = vld [vmem:[%s4382_s4 + $0x4a4] ss:$16 sps:$4 sm:$0xff]  }
 0x18f   :  { %2290 = vmatprep.subr.bf16.mxu1 %v3233_v63  ;;  %2413 = vmatprep.subr.bf16.mxu0 %v3236_v1  ;;  %v3288_v63 = vld [vmem:[%s4382_s4 + $0x4a0] ss:$16 sps:$4 sm:$0xff]   ;;  %v3293_v1 = vld [vmem:[%s4382_s4 + $0x4c4] ss:$16 sps:$4 sm:$0xff]  }
 0x192   :  { %2291 = vmatpush1.bf16.msra.mxu1 %v3231_v2  ;;  %2414 = vmatpush1.bf16.msra.mxu0 %v3234_v3  ;;  %v3291_v3 = vld [vmem:[%s4382_s4 + $0x4c0] ss:$16 sps:$4 sm:$0xff]  }
 0x193   :  { %2292 = vmatprep.subr.bf16.mxu1 %v3239_v4  ;;  %2415 = vmatprep.subr.bf16.mxu0 %v3242_v5  ;;  %v3296_v4 = vld [vmem:[%s4382_s4 + $0x4e4] ss:$16 sps:$4 sm:$0xff]  }
 0x195   :  { %v1209_v10 = vpop.f32.mrb[8].mxu0 }
 0x196   :  { %2293 = vmatpush1.bf16.msra.mxu1 %v3237_v6  ;;  %2416 = vmatpush1.bf16.msra.mxu0 %v3240_v7  ;;  %v1224_v15 = vmul.f32 %v1209_v10, %v1209_v10  ;;  %v1211_v16 = vpop.f32.mrb[9].mxu0  ;;  %v3294_v6 = vld [vmem:[%s4382_s4 + $0x4e0] ss:$16 sps:$4 sm:$0xff]   ;;  %v3297_v10 = vld [vmem:[%s4382_s4 + $0x408] ss:$16 sps:$4 sm:$0xff]  }
 0x197   :  { %2294 = vmatprep.subr.bf16.mxu1 %v3245_v8  ;;  %2417 = vmatprep.subr.bf16.mxu0 %v3248_v9  ;;  %v1225_v20 = vmul.f32 %v1211_v16, %v1211_v16  ;;  %v1213_v21 = vpop.f32.mrb[10].mxu0  ;;  %v3299_v8 = vld [vmem:[%s4382_s4 + $0x40c] ss:$16 sps:$4 sm:$0xff]   ;;  %v3303_v16 = vld [vmem:[%s4382_s4 + $0x448] ss:$16 sps:$4 sm:$0xff]  }
 0x198   :  { %v1229_v22 = vadd.f32 %v1224_v15, %v1219_v13  ;;  %v1214_v23 = vpop.f32.mrb[11].mxu0  ;;  %v3300_v13 = vld [vmem:[%s4382_s4 + $0x428] ss:$16 sps:$4 sm:$0xff]   ;;  %v3305_v15 = vld [vmem:[%s4382_s4 + $0x44c] ss:$16 sps:$4 sm:$0xff]  }
 0x199   :  { %v4223_v56 = vadd.f32 %v1225_v20, %v1220_v19  ;;  %v3311_v19 = vld [vmem:[%s4382_s4 + $0x48c] ss:$16 sps:$4 sm:$0xff]   ;;  %v3309_v20 = vld [vmem:[%s4382_s4 + $0x488] ss:$16 sps:$4 sm:$0xff]  }
 0x19a   :  { %2295 = vmatpush1.bf16.msra.mxu1 %v3243_v11  ;;  %2418 = vmatpush1.bf16.msra.mxu0 %v3246_v12  ;;  %3327 = vrsqrt.f32 %v1229_v22  ;;  %vm1254_vm5 = vcmp.eq.f32.partialorder %v1229_v22, inf  ;;  %v1257_v42 = vand.u32 2147483648, %v1229_v22  ;;  %vm1256_vm7 = vcmp.eq.f32.partialorder %v1229_v22, 0.0  ;;  %v3302_v12 = vld [vmem:[%s4382_s4 + $0x42c] ss:$16 sps:$4 sm:$0xff]  }
 0x19b   :  { %2296 = vmatprep.subr.bf16.mxu1 %v3251_v17  ;;  %2419 = vmatprep.subr.bf16.mxu0 %v3254_v18  ;;  %3329 = vrsqrt.f32 %v4223_v56  ;;  %vm1261_vm8 = vcmp.eq.f32.partialorder %v4223_v56, inf  ;;  %v1264_v7 = vand.u32 2147483648, %v4223_v56  ;;  %vm1263_vm9 = vcmp.eq.f32.partialorder %v4223_v56, 0.0  ;;  %v3308_v17 = vld [vmem:[%s4382_s4 + $0x46c] ss:$16 sps:$4 sm:$0xff]  }
 0x19c   :  { %v3306_v18 = vld [vmem:[%s4382_s4 + $0x468] ss:$16 sps:$4 sm:$0xff]   ;;  %v3314_v21 = vld [vmem:[%s4382_s4 + $0x4ac] ss:$16 sps:$4 sm:$0xff]  }
 0x19d   :  { %v3317_v23 = vld [vmem:[%s4382_s4 + $0x4cc] ss:$16 sps:$4 sm:$0xff]  }
 0x19e   :  { %2297 = vmatpush1.bf16.msra.mxu1 %v3249_v24  ;;  %2420 = vmatpush1.bf16.msra.mxu0 %v3252_v0  ;;  %v3320_v24 = vld [vmem:[%s4382_s4 + $0x4ec] ss:$16 sps:$4 sm:$0xff]   ;;  %v3318_v0 = vld [vmem:[%s4382_s4 + $0x4e8] ss:$16 sps:$4 sm:$0xff]  }
 0x19f   :  { %2298 = vmatprep.subr.bf16.mxu1 %v3257_v61  ;;  %2421 = vmatprep.subr.bf16.mxu0 %v3260_v25 }
 0x1a2   :  { %2299 = vmatpush1.bf16.msra.mxu1 %v3255_v27  ;;  %2422 = vmatpush1.bf16.msra.mxu0 %v3258_v28 }
 0x1a3   :  { %2300 = vmatprep.subr.bf16.mxu1 %v3263_v29  ;;  %2423 = vmatprep.subr.bf16.mxu0 %v3266_v30 }
 0x1a4   :  { %v3328_v36 = vpop.eup %3327 }
 0x1a5   :  { %v1253_v40 = vmul.f32 %v3328_v36, %v1229_v22  ;;  %v3330_v62 = vpop.eup %3329 }
 0x1a6   :  { %2301 = vmatpush1.bf16.msra.mxu1 %v3261_v32  ;;  %2424 = vmatpush1.bf16.msra.mxu0 %v3264_v33  ;;  %v1260_v2 = vmul.f32 %v3330_v62, %v4223_v56  ;;  %v3332_v33 = vmov 1983009808  }
 0x1a7   :  { %2302 = vmatprep.subr.bf16.mxu1 %v3269_v34  ;;  %2425 = vmatprep.subr.bf16.mxu0 %v3272_v35  ;;  %v1255_v45 = vsel %vm1254_vm5, %v1229_v22, %v1253_v40  ;;  %v3312_v22 = vld [vmem:[%s4382_s4 + $0x4a8] ss:$16 sps:$4 sm:$0xff]   ;;  %v2484_v34 = vunpack.c.l.s4 %v3332_v33 }
 0x1a8   :  { %v1258_v47 = vsel %vm1256_vm7, %v1257_v42, %v1255_v45  ;;  %v1262_v5 = vsel %vm1261_vm8, %v4223_v56, %v1260_v2  ;;  %v3315_v56 = vld [vmem:[%s4382_s4 + $0x4c8] ss:$16 sps:$4 sm:$0xff]  }
 0x1a9   :  { %v1269_v48 = vpack.c.bf16 %v1258_v47, %v1258_v47  ;;  %v1265_v9 = vsel %vm1263_vm9, %v1264_v7, %v1262_v5  ;;  %v2485_v35 = vunpack.c.0.s8 %v2484_v34 }
 0x1aa   :  { %2303 = vmatpush1.bf16.msra.mxu1 %v3267_v38  ;;  %2426 = vmatpush1.bf16.msra.mxu0 %v3270_v39  ;;  %v1270_v11 = vpack.c.bf16 %v1265_v9, %v1265_v9 }
 0x1ab   :  { %2313 = vmatprep.subr.bf16.mxu1 %v3275_v44  ;;  %2304 = vmatprep.mubr.bf16.mxu1 %v1269_v48  ;;  %v2488_v39 = vsub.s32 %v2485_v35, %v3489_v43 }
 0x1ac   :  { %2427 = vmatprep.mubr.bf16.mxu0 %v1269_v48 }
 0x1ad   :  { %2305 = vmatmul.mubr.bf16.vlgmr.msra.gmra.mrb[8].mxu1 %v1268_v50  ;;  %2428 = vmatmul.mubr.bf16.vlgmr.msra.gmra.mrb[12].mxu0 %v1268_v50 }
 0x1ae   :  { %2314 = vmatpush1.bf16.msra.mxu1 %v3273_v49  ;;  %2345 = vmatprep.mubr.bf16.mxu1 %v3331_v52 }
 0x1af   :  { %2315 = vmatprep.subr.bf16.mxu1 %v3278_v51 }
 0x1b2   :  { %2316 = vmatpush1.bf16.msra.mxu1 %v3276_v14 }
 0x1b3   :  { %2317 = vmatprep.subr.bf16.mxu1 %v3281_v53 }
 0x1b6   :  { %2318 = vmatpush1.bf16.msra.mxu1 %v3279_v54 }
 0x1b7   :  { %2319 = vmatprep.subr.bf16.mxu1 %v3284_v55 }
 0x1ba   :  { %2320 = vmatpush1.bf16.msra.mxu1 %v3282_v57 }
 0x1bb   :  { %2321 = vmatprep.subr.bf16.mxu1 %v3287_v58 }
 0x1be   :  { %2322 = vmatpush1.bf16.msra.mxu1 %v3285_v59 }
 0x1bf   :  { %2323 = vmatprep.subr.bf16.mxu1 %v3290_v60 }
 0x1c2   :  { %2324 = vmatpush1.bf16.msra.mxu1 %v3288_v63 }
 0x1c3   :  { %2325 = vmatprep.subr.bf16.mxu1 %v3293_v1 }
 0x1c6   :  { %2326 = vmatpush1.bf16.msra.mxu1 %v3291_v3 }
 0x1c7   :  { %2327 = vmatprep.subr.bf16.mxu1 %v3296_v4 }
 0x1ca   :  { %2328 = vmatpush1.bf16.msra.mxu1 %v3294_v6 }
 0x1cb   :  { %2436 = vmatprep.subr.bf16.mxu1 %v3299_v8 }
 0x1cd   :  { %2346 = vmatmul.mubr.bf16.vlgmr.msra.gmra.mrb[8].mxu1 %v1270_v11 }
 0x1ce   :  { %2437 = vmatpush1.bf16.msra.mxu1 %v3297_v10  ;;  %2468 = vmatprep.mubr.bf16.mxu1 %v3331_v52 }
 0x1cf   :  { %2438 = vmatprep.subr.bf16.mxu1 %v3302_v12 }
 0x1d2   :  { %2439 = vmatpush1.bf16.msra.mxu1 %v3300_v13 }
 0x1d3   :  { %2440 = vmatprep.subr.bf16.mxu1 %v3305_v15 }
 0x1d6   :  { %2441 = vmatpush1.bf16.msra.mxu1 %v3303_v16 }
 0x1d7   :  { %2442 = vmatprep.subr.bf16.mxu1 %v3308_v17 }
 0x1da   :  { %2443 = vmatpush1.bf16.msra.mxu1 %v3306_v18 }
 0x1db   :  { %2444 = vmatprep.subr.bf16.mxu1 %v3311_v19 }
 0x1de   :  { %2445 = vmatpush1.bf16.msra.mxu1 %v3309_v20 }
 0x1df   :  { %2446 = vmatprep.subr.bf16.mxu1 %v3314_v21 }
 0x1e2   :  { %2447 = vmatpush1.bf16.msra.mxu1 %v3312_v22 }
 0x1e3   :  { %2448 = vmatprep.subr.bf16.mxu1 %v3317_v23 }
 0x1e6   :  { %2449 = vmatpush1.bf16.msra.mxu1 %v3315_v56 }
 0x1e7   :  { %2450 = vmatprep.subr.bf16.mxu1 %v3320_v24 }
 0x1ea   :  { %2451 = vmatpush1.bf16.msra.mxu1 %v3318_v0 }
 0x1ed   :  { %2469 = vmatmul.mubr.bf16.vlgmr.msra.gmra.mrb[12].mxu1 %v1270_v11 }
 0x280   :  { %v2429_v61 = vpop.f32.mrb[12].mxu0 }
 0x281   :  { %v2431_v25 = vpop.f32.mrb[13].mxu0 }
 0x282   :  { %v2433_v26 = vpop.f32.mrb[14].mxu0 }
 0x283   :  { %v2434_v27 = vpop.f32.mrb[15].mxu0 }
 0x2a0   :  { %v2347_v28 = vpop.f32.mrb[8].mxu1 }
 0x2a1   :  { %v2349_v29 = vpop.f32.mrb[9].mxu1 }
 0x2a2   :  { %v2481_v30 = vcombine.low %v2347_v28, %v2349_v29  ;;  %v2351_v31 = vpop.f32.mrb[10].mxu1 }
 0x2a3   :  { %v2352_v32 = vpop.f32.mrb[11].mxu1 }
 0x2a4   :  { %v2489_v45 = vrot.slane %v2481_v30, %v2488_v39 }
 0x2c0   :  { %v2470_v36 = vpop.f32.mrb[12].mxu1 }
 0x2c1   :  { %v2825_v37 = vadd.f32 %v2470_v36, %v2429_v61  ;;  %v2472_v38 = vpop.f32.mrb[13].mxu1 }
 0x2c2   :  { %v2826_v40 = vadd.f32 %v2472_v38, %v2431_v25  ;;  %v2474_v41 = vpop.f32.mrb[14].mxu1 }
 0x2c3   :  { %v2475_v42 = vpop.f32.mrb[15].mxu1 }
 0x2c4   :  { %v2482_v44 = vcombine.low %v2825_v37, %v2826_v40 }
 0x2c6   :  { %v2496_v46 = vrot.slane %v2482_v44, %v2488_v39 }
 0x2c8   :  { %v2497_v47 = vcombine.low %v2489_v45, %v2496_v46 }
 0x2ca   :  { %2499 = vst [vmem:[%s4383_s5] sm:$0xff] %v2497_v47 }

</bundles_post_ra>
